<compile_context>
chip_gen: v6e
topology: v6e:2x2x1
jax: 0.10.0
libtpu: 0.0.40
codegen_flags: <defaults>
</compile_context>

<pallas_src>
import functools
import math

import jax
import jax.numpy as jnp
from jax.experimental import pallas as pl
from jax.experimental.pallas import tpu as pltpu


def _round_up(a, b):
    return (a + b - 1) // b * b


# ----------------------------------------------------------------------------
# Pallas kernel: fused conv1d(x3, as one K-concat matmul) + bias + ReLU
#                + masked max-pool + FC
# ----------------------------------------------------------------------------
def _cnn_kernel(x_ref,        # (1, Bt*L_pad, K_pad)  bf16 im2col activation slab
                w_ref,        # (K_pad, F_pad)        bf16 fused conv weight bank
                b_ref,        # (1, F_pad)            f32  fused conv bias
                m_ref,        # (L_pad, F_pad)        f32  0/1 valid-position pool mask
                fcw_ref,      # (F_pad, C_pad)        bf16 FC weight (padded)
                fcb_ref,      # (1, C_pad)            f32  FC bias (padded)
                out_ref,      # (Bt, C_pad)           f32  logits slab
                *, batch_block, l_pad):
    f_pad = w_ref.shape[1]

    # Single MXU matmul: (Bt*L_pad, K_pad) @ (K_pad, F_pad) -> f32 acc.
    acc = jnp.dot(x_ref[0], w_ref[...], preferred_element_type=jnp.float32)
    acc = jnp.maximum(acc + b_ref[...], 0.0)                  # bias + ReLU (VPU, f32)

    # Mask invalid time positions (per-branch trailing positions + padding rows) to 0
    # before the max-pool.  Exact because ReLU output is >= 0 and every lane has at
    # least one valid position.
    acc = acc.reshape(batch_block, l_pad, f_pad) * m_ref[...][None, :, :]
    pooled = jnp.max(acc, axis=1)                             # (Bt, F_pad)

    # dropout (p=0.5) is identity at inference time.
    # TODO(synk): training-mode dropout (RNG mask) is intentionally omitted.
    logits = jnp.dot(pooled.astype(fcw_ref.dtype), fcw_ref[...],
                     preferred_element_type=jnp.float32) + fcb_ref[...]
    out_ref[...] = logits.astype(out_ref.dtype)


# ----------------------------------------------------------------------------
# Parameters (deterministic, synthetic — PyTorch layouts)
# ----------------------------------------------------------------------------
def init_params(key, vocab_size=50, embed_dim=32, filter_sizes=(3, 4, 5),
                num_filters=(16, 16, 16), num_classes=2):
    n_keys = 2 * len(filter_sizes) + 3
    keys = jax.random.split(key, n_keys)
    emb = 0.5 * jax.random.normal(keys[0], (vocab_size, embed_dim), jnp.float32)
    emb = emb.at[0].set(0.0)                               # padding_idx=0
    convs = []
    for i, (k, f) in enumerate(zip(filter_sizes, num_filters)):
        bound = 1.0 / math.sqrt(embed_dim * k)
        w = jax.random.uniform(keys[1 + 2 * i], (f, embed_dim, k),
                               jnp.float32, -bound, bound)  # Conv1d (out, in, k)
        b = jax.random.uniform(keys[2 + 2 * i], (f,), jnp.float32, -bound, bound)
        convs.append((w, b))
    sum_f = sum(num_filters)
    bound = 1.0 / math.sqrt(sum_f)
    fcw = jax.random.uniform(keys[-2], (num_classes, sum_f),
                             jnp.float32, -bound, bound)    # Linear (out, in)
    fcb = jax.random.uniform(keys[-1], (num_classes,), jnp.float32, -bound, bound)
    return {"embedding": emb, "convs": convs, "fc": (fcw, fcb)}


# ----------------------------------------------------------------------------
# Forward wrapper
# ----------------------------------------------------------------------------
def text_cnn_forward(input_ids, params, *, batch_block=256,
                     compute_dtype=jnp.bfloat16):
    convs = params["convs"]
    filter_sizes = [int(w.shape[2]) for (w, _) in convs]
    num_filters = [int(w.shape[0]) for (w, _) in convs]
    k_max = max(filter_sizes)
    sum_f = sum(num_filters)
    fcw_t, fcb_t = params["fc"]
    C = int(fcw_t.shape[0])

    B, L = input_ids.shape
    emb = params["embedding"].astype(jnp.float32)
    E = int(emb.shape[1])

    # Invariants the mask-before-max trick relies on (see perf review):
    #  - every branch must have >= 1 valid conv position so masking to 0 is exact,
    #  - l_pad >= L so masked shifted rows never reach the next example's data.
    assert all(L >= k for k in filter_sizes), "sequence shorter than a filter"
    l_pad = _round_up(L, 8)
    assert l_pad >= L

    # nn.Embedding(max_norm=5.0): row-wise renorm applied to the TABLE once, then a
    # single bf16 cast + gather (numerically identical to renorming looked-up rows).
    norms = jnp.sqrt(jnp.sum(emb * emb, axis=-1, keepdims=True))
    emb = emb * jnp.minimum(1.0, 5.0 / jnp.maximum(norms, 1e-12))
    x = emb.astype(compute_dtype)[input_ids]                 # (B, L, E) bf16

    f_pad = _round_up(sum_f, 128)          # lane-dense feature width
    c_pad = _round_up(C, 128)              # lane-dense output width
    k_in = k_max * E                       # im2col contraction depth
    k_pad = _round_up(k_in, 128)

    # --- batch blocking ------------------------------------------------------
    bt = max(8, _round_up(min(batch_block, B), 8))
    if B > 8 and pl.cdiv(B, bt) < 2:       # v7x megacore: keep >= 2 parallel grid steps
        bt = max(8, _round_up(pl.cdiv(B, 2), 8))
    g = pl.cdiv(B, bt)
    b_padded = g * bt
    p = bt * l_pad                         # conv positions per block

    # --- host-side layout: pad, flatten per block, im2col over k_max taps ----
    xp = jnp.zeros((b_padded, l_pad, E), compute_dtype).at[:B, :L, :].set(x)
    x_flat = xp.reshape(g, p, E)
    x_flat = jnp.pad(x_flat, ((0, 0), (0, k_max - 1), (0, 0)))      # per-block tail
    x_cat = jnp.concatenate([x_flat[:, j:j + p, :] for j in range(k_max)], axis=-1)
    if k_pad > k_in:
        x_cat = jnp.pad(x_cat, ((0, 0), (0, 0), (0, k_pad - k_in)))  # (g, p, k_pad)

    # --- fused, lane-padded weight bank + pool mask ---------------------------
    w2 = jnp.zeros((k_pad, f_pad), jnp.float32)
    b_cat = jnp.zeros((1, f_pad), jnp.float32)
    pool_mask = jnp.zeros((l_pad, f_pad), jnp.float32)
    off = 0
    for (w, b), k, f in zip(convs, filter_sizes, num_filters):
        for j in range(k):                 # tap j of branch -> rows j*E:(j+1)*E
            w2 = w2.at[j * E:(j + 1) * E, off:off + f].set(w[:, :, j].T)
        b_cat = b_cat.at[0, off:off + f].set(b)
        valid = (jnp.arange(l_pad) < (L - k + 1)).astype(jnp.float32)
        pool_mask = pool_mask.at[:, off:off + f].set(
            jnp.broadcast_to(valid[:, None], (l_pad, f)))
        off += f
    fcw = jnp.zeros((f_pad, c_pad), jnp.float32).at[:sum_f, :C].set(fcw_t.T)
    fcb = jnp.zeros((1, c_pad), jnp.float32).at[0, :C].set(fcb_t)

    kernel = functools.partial(_cnn_kernel, batch_block=bt, l_pad=l_pad)
    out = pl.pallas_call(
        kernel,
        out_shape=jax.ShapeDtypeStruct((b_padded, c_pad), jnp.float32),
        grid=(g,),
        in_specs=[
            pl.BlockSpec((1, p, k_pad), lambda i: (i, 0, 0)),
            pl.BlockSpec((k_pad, f_pad), lambda i: (0, 0)),
            pl.BlockSpec((1, f_pad), lambda i: (0, 0)),
            pl.BlockSpec((l_pad, f_pad), lambda i: (0, 0)),
            pl.BlockSpec((f_pad, c_pad), lambda i: (0, 0)),
            pl.BlockSpec((1, c_pad), lambda i: (0, 0)),
        ],
        out_specs=pl.BlockSpec((bt, c_pad), lambda i: (i, 0)),
        compiler_params=pltpu.CompilerParams(
            dimension_semantics=("parallel",)),
    )(x_cat, w2.astype(compute_dtype), b_cat, pool_mask,
      fcw.astype(compute_dtype), fcb)

    # Padded batch rows hold relu(bias)-derived junk; they are discarded here.
    return out[:B, :C]


# ----------------------------------------------------------------------------
# Pure-JAX fp32 reference (mirrors the PyTorch forward) for a correctness check
# ----------------------------------------------------------------------------
def reference_forward(input_ids, params):
    emb = params["embedding"]
    x = emb[input_ids]                                       # (B, L, E)
    norms = jnp.sqrt(jnp.sum(x * x, axis=-1, keepdims=True))
    x = x * jnp.minimum(1.0, 5.0 / jnp.maximum(norms, 1e-12))
    xr = jnp.transpose(x, (0, 2, 1))                         # (B, E, L) == NCW
    pooled = []
    for (w, b) in params["convs"]:                           # w: (F, E, k)
        conv = jax.lax.conv_general_dilated(
            xr, w, (1,), "VALID", dimension_numbers=("NCH", "OIH", "NCH"))
        conv = jax.nn.relu(conv + b[None, :, None])
        pooled.append(jnp.max(conv, axis=2))
    feat = jnp.concatenate(pooled, axis=1)
    fcw, fcb = params["fc"]
    return feat @ fcw.T + fcb


if __name__ == "__main__":
    key = jax.random.PRNGKey(0)
    pkey, dkey = jax.random.split(key)
    params = init_params(pkey, vocab_size=50, embed_dim=32,
                         filter_sizes=(3, 4, 5), num_filters=(16, 16, 16),
                         num_classes=2)
    B, L = 2, 16
    input_ids = jax.random.randint(dkey, (B, L), 0, 50)

    logits = text_cnn_forward(input_ids, params)
    jax.block_until_ready(logits)

    ref = reference_forward(input_ids, params)
    assert logits.shape == (B, 2), logits.shape
    # bf16 embeddings / MXU inputs vs fp32 reference -> loosened tolerance.
    assert jnp.allclose(logits, ref, atol=3e-2, rtol=3e-2), (logits, ref)
    print("KERNEL_OK")
</pallas_src>

<mosaic_0001>
module attributes {stable_mosaic.version = 11 : i64} {
  func.func @_cnn_kernel(%arg0: i32, %arg1: memref<1x128x256xbf16, #tpu.memory_space<vmem>>, %arg2: memref<256x128xbf16, #tpu.memory_space<vmem>>, %arg3: memref<1x128xf32, #tpu.memory_space<vmem>>, %arg4: memref<16x128xf32, #tpu.memory_space<vmem>>, %arg5: memref<128x128xbf16, #tpu.memory_space<vmem>>, %arg6: memref<1x128xf32, #tpu.memory_space<vmem>>, %arg7: memref<8x128xf32, #tpu.memory_space<vmem>>) attributes {dimension_semantics = [#tpu.dimension_semantics<parallel>], iteration_bounds = array<i64: 1>, scalar_prefetch = 0 : i64, scratch_operands = 0 : i64, tpu.core_type = #tpu.core_type<tc>, window_params = [{transform_indices = @transform_0, window_bounds = array<i64: 1, 128, 256>}, {pipeline_mode = #tpu.pipeline_mode<synchronous>, transform_indices = @transform_1, window_bounds = array<i64: 256, 128>}, {pipeline_mode = #tpu.pipeline_mode<synchronous>, transform_indices = @transform_2, window_bounds = array<i64: 1, 128>}, {pipeline_mode = #tpu.pipeline_mode<synchronous>, transform_indices = @transform_3, window_bounds = array<i64: 16, 128>}, {pipeline_mode = #tpu.pipeline_mode<synchronous>, transform_indices = @transform_4, window_bounds = array<i64: 128, 128>}, {pipeline_mode = #tpu.pipeline_mode<synchronous>, transform_indices = @transform_5, window_bounds = array<i64: 1, 128>}, {transform_indices = @transform_6, window_bounds = array<i64: 8, 128>}]} {
    %c0 = arith.constant 0 : index
    %c0_0 = arith.constant 0 : index
    %c0_1 = arith.constant 0 : index
    %0 = vector.load %arg1[%c0, %c0_0, %c0_1] : memref<1x128x256xbf16, #tpu.memory_space<vmem>>, vector<1x128x256xbf16>
    %1 = vector.shape_cast %0 : vector<1x128x256xbf16> to vector<128x256xbf16>
    %c0_2 = arith.constant 0 : index
    %c0_3 = arith.constant 0 : index
    %2 = vector.load %arg2[%c0_2, %c0_3] : memref<256x128xbf16, #tpu.memory_space<vmem>>, vector<256x128xbf16>
    %cst = arith.constant dense<0.000000e+00> : vector<128x128xf32>
    %3 = tpu.matmul %1, %2, %cst {dimension_numbers = #tpu.dot_dimension_numbers<[1], [0], [0], [1], [0, 0, 1, 1], [], []>} : vector<128x256xbf16>, vector<256x128xbf16>, vector<128x128xf32> -> vector<128x128xf32>
    %c0_4 = arith.constant 0 : index
    %c0_5 = arith.constant 0 : index
    %4 = vector.load %arg3[%c0_4, %c0_5] : memref<1x128xf32, #tpu.memory_space<vmem>>, vector<1x128xf32>
    %5 = vector.broadcast %4 : vector<1x128xf32> to vector<128x128xf32>
    %6 = arith.addf %3, %5 : vector<128x128xf32>
    %cst_6 = arith.constant 0.000000e+00 : f32
    %7 = vector.broadcast %cst_6 : f32 to vector<128x128xf32>
    %8 = arith.maximumf %6, %7 : vector<128x128xf32>
    %9 = vector.shape_cast %8 : vector<128x128xf32> to vector<8x16x128xf32>
    %c0_7 = arith.constant 0 : index
    %c0_8 = arith.constant 0 : index
    %10 = vector.load %arg4[%c0_7, %c0_8] : memref<16x128xf32, #tpu.memory_space<vmem>>, vector<16x128xf32>
    %11 = vector.shape_cast %10 : vector<16x128xf32> to vector<1x16x128xf32>
    %12 = vector.broadcast %11 : vector<1x16x128xf32> to vector<8x16x128xf32>
    %13 = arith.mulf %9, %12 : vector<8x16x128xf32>
    %cst_9 = arith.constant dense<0xFF800000> : vector<8x128xf32>
    %14 = vector.multi_reduction <maximumf>, %13, %cst_9 [1] : vector<8x16x128xf32> to vector<8x128xf32>
    %15 = arith.truncf %14 : vector<8x128xf32> to vector<8x128xbf16>
    %c0_10 = arith.constant 0 : index
    %c0_11 = arith.constant 0 : index
    %16 = vector.load %arg5[%c0_10, %c0_11] : memref<128x128xbf16, #tpu.memory_space<vmem>>, vector<128x128xbf16>
    %cst_12 = arith.constant dense<0.000000e+00> : vector<8x128xf32>
    %17 = tpu.matmul %15, %16, %cst_12 {dimension_numbers = #tpu.dot_dimension_numbers<[1], [0], [0], [1], [0, 0, 1, 1], [], []>} : vector<8x128xbf16>, vector<128x128xbf16>, vector<8x128xf32> -> vector<8x128xf32>
    %c0_13 = arith.constant 0 : index
    %c0_14 = arith.constant 0 : index
    %18 = vector.load %arg6[%c0_13, %c0_14] : memref<1x128xf32, #tpu.memory_space<vmem>>, vector<1x128xf32>
    %19 = vector.broadcast %18 : vector<1x128xf32> to vector<8x128xf32>
    %20 = arith.addf %17, %19 : vector<8x128xf32>
    %c0_15 = arith.constant 0 : index
    %c0_16 = arith.constant 0 : index
    %21 = vector.load %arg7[%c0_15, %c0_16] : memref<8x128xf32, #tpu.memory_space<vmem>>, vector<8x128xf32>
    tpu.vector_store %arg7[%c0_15, %c0_16], %20 {strides = array<i32>} : memref<8x128xf32, #tpu.memory_space<vmem>>, vector<8x128xf32>,
    return
  }
  func.func @transform_0(%arg0: i32) -> (i32, i32, i32) {
    %c0_i32 = arith.constant 0 : i32
    %c0_i32_0 = arith.constant 0 : i32
    %c0_i32_1 = arith.constant 0 : i32
    return %arg0, %c0_i32, %c0_i32_0 : i32, i32, i32
  }
  func.func @transform_1(%arg0: i32) -> (i32, i32) {
    %c0_i32 = arith.constant 0 : i32
    %c0_i32_0 = arith.constant 0 : i32
    %c0_i32_1 = arith.constant 0 : i32
    return %c0_i32, %c0_i32_0 : i32, i32
  }
  func.func @transform_2(%arg0: i32) -> (i32, i32) {
    %c0_i32 = arith.constant 0 : i32
    %c0_i32_0 = arith.constant 0 : i32
    %c0_i32_1 = arith.constant 0 : i32
    return %c0_i32, %c0_i32_0 : i32, i32
  }
  func.func @transform_3(%arg0: i32) -> (i32, i32) {
    %c0_i32 = arith.constant 0 : i32
    %c0_i32_0 = arith.constant 0 : i32
    %c0_i32_1 = arith.constant 0 : i32
    return %c0_i32, %c0_i32_0 : i32, i32
  }
  func.func @transform_4(%arg0: i32) -> (i32, i32) {
    %c0_i32 = arith.constant 0 : i32
    %c0_i32_0 = arith.constant 0 : i32
    %c0_i32_1 = arith.constant 0 : i32
    return %c0_i32, %c0_i32_0 : i32, i32
  }
  func.func @transform_5(%arg0: i32) -> (i32, i32) {
    %c0_i32 = arith.constant 0 : i32
    %c0_i32_0 = arith.constant 0 : i32
    %c0_i32_1 = arith.constant 0 : i32
    return %c0_i32, %c0_i32_0 : i32, i32
  }
  func.func @transform_6(%arg0: i32) -> (i32, i32) {
    %c0_i32 = arith.constant 0 : i32
    %c0_i32_0 = arith.constant 0 : i32
    return %arg0, %c0_i32 : i32, i32
  }
}

</mosaic_0001>

<bundles_post_ra>
// kernel: tpu_custom_call.1
= control target key start
LH: loop header
LB: loop body
LE: loop exit
PB: predicated region body
PF: predicated region fallthrough
CT: control target
= control target key end

     0   :  { %11 = vsyncpa [#allocation3], 0  ;;  %s1080_s0 = inlined_call_operand.hbm [shape: bf16[1,128,256], index: 0, kind: input, shape index: {}]   ;;  %s1081_s1 = inlined_call_operand.hbm [shape: bf16[256,128], index: 1, kind: input, shape index: {}]   ;;  %s1082_s2 = inlined_call_operand.vmem [shape: f32[1,128], index: 2, kind: input, shape index: {}]   ;;  %s1083_s3 = inlined_call_operand.hbm [shape: f32[16,128], index: 3, kind: input, shape index: {}]   ;;  %s1084_s4 = inlined_call_operand.hbm [shape: bf16[128,128], index: 4, kind: input, shape index: {}]   ;;  %s1085_s5 = inlined_call_operand.vmem [shape: f32[1,128], index: 5, kind: input, shape index: {}]   ;;  %s1086_s6 = inlined_call_operand.hbm [shape: f32[8,128], index: 6, kind: output, shape index: {}]  }
   0x1   :  { %12 = vsyncpa [#allocation6], 0 }
   0x2   :  { %13 = vsyncpa [#allocation9], 0 }
   0x3   :  { %14 = vsyncpa [#allocation4], 0  ;;  %s969_s21 = smov [#allocation5]  }
   0x4   :  { %s32_s22 = sshll.u32 %s969_s21, 4  ;;  %s33_s22 = int_to_ptr.vmem [resolvable:$true] %s32_s22 }
   0x5   :  { %s869_s23 = scalar_lea.vmem %s33_s22, 2048  ;;  %p874_p1 = scmp.lt.s32.totalorder %s33_s22, %s33_s22 }
   0x6   :  { %p870_p0 = scmp.ne.s32.totalorder %s33_s22, %s869_s23  ;;  %p875_p2 = scmp.lt.s32.totalorder %s869_s23, %s869_s23 }
   0x8   :  { %p876_p3 = por %p875_p2, %p874_p1 }
   0xa   :  { %p877_p4 = pnand %p876_p3, %p870_p0 }
   0xc   :  { %880 = shalt.err (!%p877_p4)
}
   0xd   :  { %s970_s24 = smov 64   ;;  %s971_s25 = smov 4  }
   0xe   :  { %38 = dma.hbm_to_vmem [thread:$0]  %s1081_s1, 2048, %s33_s22, [#allocation6], %s970_s24, %s970_s24, %s971_s25  }
   0xf   :  { %s972_s28 = smov [#allocation2]  }
  0x10   :  { %s20_s29 = sshll.u32 %s972_s28, 4  ;;  %s21_s29 = int_to_ptr.vmem [resolvable:$true] %s20_s29 }
  0x11   :  { %s889_s30 = scalar_lea.vmem %s21_s29, 2048  ;;  %p894_p6 = scmp.lt.s32.totalorder %s21_s29, %s21_s29 }
  0x12   :  { %p890_p5 = scmp.ne.s32.totalorder %s21_s29, %s889_s30  ;;  %p895_p7 = scmp.lt.s32.totalorder %s889_s30, %s889_s30 }
  0x14   :  { %p896_p8 = por %p895_p7, %p894_p6 }
  0x16   :  { %p897_p9 = pnand %p896_p8, %p890_p5 }
  0x18   :  { %900 = shalt.err (!%p897_p9)
}
  0x19   :  { %s973_s7 = smov 128   ;;  %s974_s8 = smov 8  }
  0x1a   :  { %26 = dma.hbm_to_vmem [thread:$0]  %s1080_s0, 2048, %s21_s29, [#allocation3], %s973_s7, %s973_s7, %s974_s8  }
  0x1b   :  { %s975_s11 = smov [#allocation7]   ;;  %s976_s13 = smov [#allocation8]  }
  0x1c   :  { %s46_s12 = sshll.u32 %s975_s11, 4  ;;  %s58_s1 = sshll.u32 %s976_s13, 4  ;;  %s47_s12 = int_to_ptr.vmem [resolvable:$true] %s46_s12  ;;  %s59_s1 = int_to_ptr.vmem [resolvable:$true] %s58_s1 }
  0x1d   :  { %s909_s14 = scalar_lea.vmem %s47_s12, 256  ;;  %p914_p11 = scmp.lt.s32.totalorder %s47_s12, %s47_s12 }
  0x1e   :  { %p910_p10 = scmp.ne.s32.totalorder %s47_s12, %s909_s14  ;;  %p915_p12 = scmp.lt.s32.totalorder %s909_s14, %s909_s14 }
  0x20   :  { %p916_p13 = por %p915_p12, %p914_p11 }
  0x22   :  { %p917_p0 = pnand %p916_p13, %p910_p10 }
  0x24   :  { %920 = shalt.err (!%p917_p0)
}
  0x25   :  { %52 = dma.hbm_to_vmem [thread:$0]  %s1083_s3, 256, %s47_s12, [#allocation6], %s973_s7, %s973_s7, %s974_s8  }
  0x26   :  { %s929_s17 = scalar_lea.vmem %s59_s1, 1024  ;;  %p934_p2 = scmp.lt.s32.totalorder %s59_s1, %s59_s1 }
  0x27   :  { %p930_p1 = scmp.ne.s32.totalorder %s59_s1, %s929_s17  ;;  %p935_p3 = scmp.lt.s32.totalorder %s929_s17, %s929_s17 }
  0x29   :  { %p936_p4 = por %p935_p3, %p934_p2 }
  0x2b   :  { %p937_p5 = pnand %p936_p4, %p930_p1 }
  0x2d   :  { %940 = shalt.err (!%p937_p5)
}
  0x2e   :  { %64 = dma.hbm_to_vmem [thread:$0]  %s1084_s4, 1024, %s59_s1, [#allocation9], %s970_s24, %s970_s24, %s971_s25  }
  0x2f   :  { %961 = dma.done.wait [#allocation3], 2048  }
  0x30   :  { %962 = vsyncadd [#allocation3], 4294965248 }
  0x31   :  { %963 = dma.done.wait [#allocation6], 2304  }
  0x32   :  { %964 = vsyncadd [#allocation6], 4294964992 }
  0x33   :  { %965 = dma.done.wait [#allocation9], 1024  }
  0x34   :  { %966 = vsyncadd [#allocation9], 4294966272  ;;  %v813_v0 = vld [vmem:[#allocation5 + $0x78] sm:$0xff]   ;;  %v815_v2 = vld [vmem:[#allocation5 + $0x70] sm:$0xff]   ;;  %v977_v33 = vmov 0.0   ;;  %vm978_vm0 = vmmov 0  }
  0x35   :  { %v814_v1 = vld [vmem:[#allocation5 + $0x38] sm:$0xff]   ;;  %709 = vmatprep.subr.bf16.mxu0 %v813_v0  ;;  %v816_v3 = vld [vmem:[#allocation5 + $0x30] sm:$0xff]   ;;  %v817_v4 = vld [vmem:[#allocation5 + $0x68] sm:$0xff]   ;;  %782 = vmatprep.subr.bf16.mxu1 %v977_v33  ;;  %vm545_vm1 = vcmask 1041409   ;;  %vm547_vm2 = vcmask 1042434   ;;  %vm549_vm3 = vcmask 1043459  }
  0x36   :  { %710 = vmatpush3.bf16.msra.mxu0 %v814_v1  ;;  %v818_v5 = vld [vmem:[#allocation5 + $0x28] sm:$0xff]   ;;  %v819_v6 = vld [vmem:[#allocation5 + $0x60] sm:$0xff]   ;;  %v821_v8 = vld [vmem:[#allocation5 + $0x58] sm:$0xff]   ;;  %798 = vmatprep.mubr.msk.bf16.mxu1 %vm978_vm0, %v977_v33  ;;  %vm551_vm4 = vcmask 1044484   ;;  %vm553_vm5 = vcmask 1045509   ;;  %vm555_vm6 = vcmask 1046534  }
  0x37   :  { %711 = vmatprep.subr.bf16.mxu0 %v815_v2  ;;  %v820_v7 = vld [vmem:[#allocation5 + $0x20] sm:$0xff]   ;;  %v822_v9 = vld [vmem:[#allocation5 + $0x18] sm:$0xff]   ;;  %v823_v10 = vld [vmem:[#allocation5 + $0x50] sm:$0xff]   ;;  %vm557_vm7 = vcmask 1047559   ;;  %s979_s20 = smov [#allocation10]  }
  0x38   :  { %v831_v11 = vld [vmem:[#allocation2 + $0x4] ss:$8 sps:$4 sm:$0xff]   ;;  %v824_v12 = vld [vmem:[#allocation5 + $0x10] sm:$0xff]   ;;  %v829_v17 = vld [vmem:[#allocation2] ss:$8 sps:$4 sm:$0xff]   ;;  %s656_s21 = sshll.u32 %s979_s20, 4  ;;  %s657_s21 = int_to_ptr.vmem [resolvable:$true] %s656_s21 }
  0x39   :  { %343 = vmatprep.mubr.bf16.mxu0 %v831_v11  ;;  %v825_v13 = vld [vmem:[#allocation5 + $0x48] sm:$0xff]   ;;  %v827_v15 = vld [vmem:[#allocation5 + $0x40] sm:$0xff]   ;;  %v832_v18 = vld [vmem:[#allocation2 + $0x14] ss:$8 sps:$4 sm:$0xff]   ;;  %s941_s22 = scalar_lea.vmem %s657_s21, 128  ;;  %p946_p7 = scmp.lt.s32.totalorder %s657_s21, %s657_s21 }
  0x3a   :  { %712 = vmatpush3.bf16.msra.mxu0 %v816_v3  ;;  %v826_v14 = vld [vmem:[#allocation5 + $0x8] sm:$0xff]   ;;  %v828_v16 = vld [vmem:[#allocation5] sm:$0xff]   ;;  %v834_v19 = vld [vmem:[#allocation2 + $0x10] ss:$8 sps:$4 sm:$0xff]   ;;  %p942_p6 = scmp.ne.s32.totalorder %s657_s21, %s941_s22  ;;  %p947_p8 = scmp.lt.s32.totalorder %s941_s22, %s941_s22 }
  0x3b   :  { %713 = vmatprep.subr.bf16.mxu0 %v817_v4  ;;  %v835_v20 = vld [vmem:[#allocation2 + $0x24] ss:$8 sps:$4 sm:$0xff]   ;;  %v837_v21 = vld [vmem:[#allocation2 + $0x20] ss:$8 sps:$4 sm:$0xff]   ;;  %v838_v22 = vld [vmem:[#allocation2 + $0x34] ss:$8 sps:$4 sm:$0xff]  }
  0x3c   :  { %v840_v23 = vld [vmem:[#allocation2 + $0x30] ss:$8 sps:$4 sm:$0xff]   ;;  %v841_v24 = vld [vmem:[#allocation2 + $0x44] ss:$8 sps:$4 sm:$0xff]   ;;  %v843_v25 = vld [vmem:[#allocation2 + $0x40] ss:$8 sps:$4 sm:$0xff]   ;;  %p948_p9 = por %p947_p8, %p946_p7 }
  0x3d   :  { %v844_v26 = vld [vmem:[#allocation2 + $0x54] ss:$8 sps:$4 sm:$0xff]   ;;  %v846_v27 = vld [vmem:[#allocation2 + $0x50] ss:$8 sps:$4 sm:$0xff]   ;;  %v847_v28 = vld [vmem:[#allocation2 + $0x64] ss:$8 sps:$4 sm:$0xff]  }
  0x3e   :  { %714 = vmatpush3.bf16.msra.mxu0 %v818_v5  ;;  %v849_v29 = vld [vmem:[#allocation2 + $0x60] ss:$8 sps:$4 sm:$0xff]   ;;  %v850_v30 = vld [vmem:[#allocation2 + $0x74] ss:$8 sps:$4 sm:$0xff]   ;;  %v852_v31 = vld [vmem:[#allocation2 + $0x70] ss:$8 sps:$4 sm:$0xff]   ;;  %p949_p10 = pnand %p948_p9, %p942_p6 }
  0x3f   :  { %715 = vmatprep.subr.bf16.mxu0 %v819_v6  ;;  %v853_v32 = vld [vmem:[#allocation8 + $0x38] sm:$0xff]   ;;  %v854_v34 = vld [vmem:[#allocation8 + $0x30] sm:$0xff]   ;;  %v855_v35 = vld [vmem:[#allocation8 + $0x28] sm:$0xff]  }
  0x40   :  { %783 = vmatpush3.bf16.msra.mxu1 %v853_v32  ;;  %v856_v36 = vld [vmem:[#allocation8 + $0x20] sm:$0xff]   ;;  %v857_v37 = vld [vmem:[#allocation8 + $0x18] sm:$0xff]   ;;  %v858_v38 = vld [vmem:[#allocation8 + $0x10] sm:$0xff]  }
  0x41   :  { %784 = vmatprep.subr.bf16.mxu1 %v977_v33  ;;  %v859_v39 = vld [vmem:[#allocation8 + $0x8] sm:$0xff]   ;;  %v860_v40 = vld [vmem:[#allocation8] sm:$0xff]   ;;  %v1036_v0 = vld [vmem:[%s1082_s2] ss:$0 sm:$0xff] }
  0x42   :  { %716 = vmatpush3.bf16.msra.mxu0 %v820_v7 }
  0x43   :  { %717 = vmatprep.subr.bf16.mxu0 %v821_v8 }
  0x44   :  { %785 = vmatpush3.bf16.msra.mxu1 %v854_v34 }
  0x45   :  { %786 = vmatprep.subr.bf16.mxu1 %v977_v33 }
  0x46   :  { %718 = vmatpush3.bf16.msra.mxu0 %v822_v9 }
  0x47   :  { %719 = vmatprep.subr.bf16.mxu0 %v823_v10 }
  0x48   :  { %787 = vmatpush3.bf16.msra.mxu1 %v855_v35 }
  0x49   :  { %788 = vmatprep.subr.bf16.mxu1 %v977_v33 }
  0x4a   :  { %720 = vmatpush3.bf16.msra.mxu0 %v824_v12 }
  0x4b   :  { %721 = vmatprep.subr.bf16.mxu0 %v825_v13 }
  0x4c   :  { %789 = vmatpush3.bf16.msra.mxu1 %v856_v36 }
  0x4d   :  { %790 = vmatprep.subr.bf16.mxu1 %v977_v33 }
  0x4e   :  { %722 = vmatpush3.bf16.msra.mxu0 %v826_v14 }
  0x4f   :  { %723 = vmatprep.subr.bf16.mxu0 %v827_v15 }
  0x50   :  { %791 = vmatpush3.bf16.msra.mxu1 %v857_v37 }
  0x51   :  { %792 = vmatprep.subr.bf16.mxu1 %v977_v33 }
  0x52   :  { %724 = vmatpush3.bf16.msra.mxu0 %v828_v16 }
  0x54   :  { %793 = vmatpush3.bf16.msra.mxu1 %v858_v38 }
  0x55   :  { %344 = vmatmul.mubr.bf16.vlgmr.msra.gmra.mxu0 %v829_v17  ;;  %794 = vmatprep.subr.bf16.mxu1 %v977_v33 }
  0x56   :  { %351 = vmatprep.mubr.bf16.mxu0 %v832_v18 }
  0x58   :  { %795 = vmatpush3.bf16.msra.mxu1 %v859_v39 }
  0x59   :  { %796 = vmatprep.subr.bf16.mxu1 %v977_v33  ;;  %v1051_v33 = vld [vmem:[#allocation7] sm:$0xff] }
  0x5c   :  { %797 = vmatpush3.bf16.msra.mxu1 %v860_v40 }
  0x5d   :  { %352 = vmatmul.mubr.bf16.gmra.mxu0 %v834_v19 }
  0x5e   :  { %359 = vmatprep.mubr.bf16.mxu0 %v835_v20 }
  0x65   :  { %360 = vmatmul.mubr.bf16.gmra.mxu0 %v837_v21 }
  0x66   :  { %367 = vmatprep.mubr.bf16.mxu0 %v838_v22 }
  0x6d   :  { %368 = vmatmul.mubr.bf16.gmra.mxu0 %v840_v23 }
  0x6e   :  { %375 = vmatprep.mubr.bf16.mxu0 %v841_v24 }
  0x75   :  { %376 = vmatmul.mubr.bf16.gmra.mxu0 %v843_v25  ;;  %v1048_v25 = vld [vmem:[#allocation7 + $0x8] sm:$0xff] }
  0x76   :  { %383 = vmatprep.mubr.bf16.mxu0 %v844_v26 }
  0x7d   :  { %384 = vmatmul.mubr.bf16.gmra.mxu0 %v846_v27 }
  0x7e   :  { %391 = vmatprep.mubr.bf16.mxu0 %v847_v28 }
  0x85   :  { %392 = vmatmul.mubr.bf16.gmra.mxu0 %v849_v29 }
  0x86   :  { %399 = vmatprep.mubr.bf16.mxu0 %v850_v30 }
  0x8d   :  { %400 = vmatmul.mubr.bf16.gmra.mxu0 %v852_v31 }
 0x115   :  { %v725_v41 = vpop.f32.mrf.mxu0 }
 0x117   :  { %v726_v42 = vpop.f32.mrf.mxu0 }
 0x118   :  { %v727_v2 = vadd.f32 %v726_v42, %v725_v41 }
 0x119   :  { %v728_v43 = vpop.f32.mrf.mxu0 }
 0x11a   :  { %v346_v14 = vadd.f32 %v727_v2, %v1036_v0 }
 0x11b   :  { %v729_v44 = vpop.f32.mrf.mxu0 }
 0x11c   :  { %v730_v60 = vadd.f32 %v729_v44, %v728_v43  ;;  %v408_v29 = vmax.f32 %v346_v14, 0.0 }
 0x11d   :  { %v731_v45 = vpop.f32.mrf.mxu0 }
 0x11e   :  { %v349_v8 = vadd.f32 %v730_v60, %v1036_v0  ;;  %v426_v44 = vmul.f32 %v1051_v33, %v408_v29 }
 0x11f   :  { %v732_v46 = vpop.f32.mrf.mxu0 }
 0x120   :  { %v733_v61 = vadd.f32 %v732_v46, %v731_v45  ;;  %v409_v21 = vmax.f32 %v349_v8, 0.0 }
 0x121   :  { %v734_v47 = vpop.f32.mrf.mxu0 }
 0x122   :  { %v354_v9 = vadd.f32 %v733_v61, %v1036_v0  ;;  %v427_v37 = vmul.f32 %v1048_v25, %v409_v21 }
 0x123   :  { %v735_v48 = vpop.f32.mrf.mxu0 }
 0x124   :  { %v736_v57 = vadd.f32 %v735_v48, %v734_v47  ;;  %v410_v22 = vmax.f32 %v354_v9, 0.0 }
 0x125   :  { %v737_v49 = vpop.f32.mrf.mxu0 }
 0x126   :  { %v357_v3 = vadd.f32 %v736_v57, %v1036_v0  ;;  %v428_v38 = vmul.f32 %v1051_v33, %v410_v22 }
 0x127   :  { %v738_v50 = vpop.f32.mrf.mxu0 }
 0x128   :  { %v739_v1 = vadd.f32 %v738_v50, %v737_v49  ;;  %v411_v15 = vmax.f32 %v357_v3, 0.0 }
 0x129   :  { %v740_v51 = vpop.f32.mrf.mxu0 }
 0x12a   :  { %v362_v12 = vadd.f32 %v739_v1, %v1036_v0  ;;  %v429_v30 = vmul.f32 %v1048_v25, %v411_v15 }
 0x12b   :  { %v741_v52 = vpop.f32.mrf.mxu0 }
 0x12c   :  { %v742_v59 = vadd.f32 %v741_v52, %v740_v51  ;;  %v412_v26 = vmax.f32 %v362_v12, 0.0  ;;  %v449_v45 = vmax.f32 %v428_v38, %v429_v30  ;;  %v442_v52 = vmax.f32 %v426_v44, %v427_v37 }
 0x12d   :  { %v743_v53 = vpop.f32.mrf.mxu0 }
 0x12e   :  { %v365_v6 = vadd.f32 %v742_v59, %v1036_v0  ;;  %v430_v41 = vmul.f32 %v1051_v33, %v412_v26  ;;  %v443_v1 = vrot.slane %v442_v52, 4 }
 0x12f   :  { %v744_v54 = vpop.f32.mrf.mxu0 }
 0x130   :  { %v745_v4 = vadd.f32 %v744_v54, %v743_v53  ;;  %v413_v18 = vmax.f32 %v365_v6, 0.0 }
 0x131   :  { %v746_v55 = vpop.f32.mrf.mxu0 }
 0x132   :  { %v370_v16 = vadd.f32 %v745_v4, %v1036_v0  ;;  %v431_v34 = vmul.f32 %v1048_v25, %v413_v18 }
 0x133   :  { %v747_v56 = vpop.f32.mrf.mxu0 }
 0x134   :  { %v748_v62 = vadd.f32 %v747_v56, %v746_v55  ;;  %v414_v31 = vmax.f32 %v370_v16, 0.0  ;;  %v456_v48 = vmax.f32 %v430_v41, %v431_v34 }
 0x135   :  { %v749_v58 = vpop.f32.mrf.mxu0 }
 0x136   :  { %v373_v10 = vadd.f32 %v748_v62, %v1036_v0  ;;  %v432_v46 = vmul.f32 %v1051_v33, %v414_v31  ;;  %v457_v60 = vrot.slane %v456_v48, 4 }
 0x137   :  { %v750_v63 = vpop.f32.mrf.mxu0 }
 0x138   :  { %v751_v7 = vadd.f32 %v750_v63, %v749_v58  ;;  %v415_v23 = vmax.f32 %v373_v10, 0.0  ;;  %v450_v58 = vrot.slane %v449_v45, 4  ;;  %v458_v9 = vmax.f32 %v456_v48, %v457_v60 }
 0x139   :  { %v752_v5 = vpop.f32.mrf.mxu0 }
 0x13a   :  { %v378_v19 = vadd.f32 %v751_v7, %v1036_v0  ;;  %v433_v39 = vmul.f32 %v1048_v25, %v415_v23  ;;  %v451_v7 = vmax.f32 %v449_v45, %v450_v58  ;;  %v459_v22 = vrot.slane %v458_v9, 2 }
 0x13b   :  { %v753_v11 = vpop.f32.mrf.mxu0 }
 0x13c   :  { %v754_v13 = vadd.f32 %v753_v11, %v752_v5  ;;  %v416_v35 = vmax.f32 %v378_v19, 0.0  ;;  %v463_v53 = vmax.f32 %v432_v46, %v433_v39  ;;  %v452_v19 = vrot.slane %v451_v7, 2 }
 0x13d   :  { %v755_v17 = vpop.f32.mrf.mxu0 }
 0x13e   :  { %v381_v20 = vadd.f32 %v754_v13, %v1036_v0  ;;  %v434_v49 = vmul.f32 %v1051_v33, %v416_v35  ;;  %v464_v2 = vrot.slane %v463_v53, 4  ;;  %v444_v13 = vmax.f32 %v442_v52, %v443_v1 }
 0x13f   :  { %v756_v24 = vpop.f32.mrf.mxu0 }
 0x140   :  { %v417_v27 = vmax.f32 %v381_v20, 0.0  ;;  %v757_v28 = vadd.f32 %v756_v24, %v755_v17  ;;  %v465_v14 = vmax.f32 %v463_v53, %v464_v2  ;;  %v445_v26 = vrot.slane %v444_v13, 2 }
 0x141   :  { %v758_v32 = vpop.f32.mrf.mxu0 }
 0x142   :  { %v386_v36 = vadd.f32 %v757_v28, %v1036_v0  ;;  %v435_v42 = vmul.f32 %v1048_v25, %v417_v27  ;;  %v466_v27 = vrot.slane %v465_v14, 2  ;;  %v446_v38 = vmax.f32 %v444_v13, %v445_v26 }
 0x143   :  { %v759_v40 = vpop.f32.mrf.mxu0 }
 0x144   :  { %v760_v43 = vadd.f32 %v759_v40, %v758_v32  ;;  %v418_v50 = vmax.f32 %v386_v36, 0.0  ;;  %v470_v55 = vmax.f32 %v434_v49, %v435_v42  ;;  %v453_v32 = vmax.f32 %v451_v7, %v452_v19 }
 0x145   :  { %v761_v47 = vpop.f32.mrf.mxu0  ;;  %v460_v36 = vmax.f32 %v458_v9, %v459_v22  ;;  %v467_v39 = vmax.f32 %v465_v14, %v466_v27  ;;  %v447_v49 = vrot.slane %v446_v38, 1 }
 0x146   :  { %v389_v51 = vadd.f32 %v760_v43, %v1036_v0  ;;  %v436_v61 = vmul.f32 %v1051_v33, %v418_v50  ;;  %v471_v4 = vrot.slane %v470_v55, 4  ;;  %v454_v44 = vrot.slane %v453_v32, 1 }
 0x147   :  { %v762_v54 = vpop.f32.mrf.mxu0  ;;  %v468_v50 = vrot.slane %v467_v39, 1 }
 0x148   :  { %v419_v56 = vmax.f32 %v389_v51, 0.0  ;;  %v763_v57 = vadd.f32 %v762_v54, %v761_v47  ;;  %v472_v16 = vmax.f32 %v470_v55, %v471_v4  ;;  %v461_v47 = vrot.slane %v460_v36, 1 }
 0x149   :  { %v764_v59 = vpop.f32.mrf.mxu0  ;;  %v455_v55 = vmax.f32 %v453_v32, %v454_v44  ;;  %v469_v60 = vmax.f32 %v467_v39, %v468_v50 }
 0x14a   :  { %v437_v62 = vmul.f32 %v1048_v25, %v419_v56  ;;  %v394_v63 = vadd.f32 %v763_v57, %v1036_v0  ;;  %v473_v30 = vrot.slane %v472_v16, 2  ;;  %v462_v58 = vmax.f32 %v460_v36, %v461_v47 }
 0x14b   :  { %v765_v3 = vpop.f32.mrf.mxu0 }
 0x14c   :  { %v477_v5 = vmax.f32 %v436_v61, %v437_v62  ;;  %v766_v6 = vadd.f32 %v765_v3, %v764_v59  ;;  %v420_v11 = vmax.f32 %v394_v63, 0.0  ;;  %v474_v42 = vmax.f32 %v472_v16, %v473_v30  ;;  %v700_v30 = vld [vmem:[%s1085_s5] ss:$0 sm:$0xff] }
 0x14d   :  { %v767_v8 = vpop.f32.mrf.mxu0  ;;  %v448_v59 = vmax.f32 %v446_v38, %v447_v49  ;;  %v499_v63 = vpack.c.bf16 %v455_v55, %v455_v55  ;;  %v500_v3 = vpack.c.bf16 %v462_v58, %v462_v58 }
 0x14e   :  { %v478_v10 = vrot.slane %v477_v5, 4  ;;  %v397_v12 = vadd.f32 %v766_v6, %v1036_v0  ;;  %v438_v23 = vmul.f32 %v1051_v33, %v420_v11  ;;  %v475_v53 = vrot.slane %v474_v42, 1 }
 0x14f   :  { %v768_v15 = vpop.f32.mrf.mxu0  ;;  %v538_v7 = vunpack.c.l.b16 %v499_v63 }
 0x150   :  { %v421_v17 = vmax.f32 %v397_v12, 0.0  ;;  %v769_v18 = vadd.f32 %v768_v15, %v767_v8  ;;  %v479_v20 = vmax.f32 %v477_v5, %v478_v10  ;;  %v476_v62 = vmax.f32 %v474_v42, %v475_v53 }
 0x151   :  { %v770_v21 = vpop.f32.mrf.mxu0  ;;  %v498_v5 = vpack.c.bf16 %v448_v59, %v448_v59  ;;  %v539_v10 = vunpack.c.l.b16 %v500_v3 }
 0x152   :  { %v439_v24 = vmul.f32 %v1048_v25, %v421_v17  ;;  %v402_v28 = vadd.f32 %v769_v18, %v1036_v0  ;;  %v480_v34 = vrot.slane %v479_v20, 2 }
 0x153   :  { %v771_v29 = vpop.f32.mrf.mxu0  ;;  %v537_v12 = vunpack.c.l.b16 %v498_v5 }
 0x154   :  { %v484_v31 = vmax.f32 %v438_v23, %v439_v24  ;;  %v772_v35 = vadd.f32 %v771_v29, %v770_v21  ;;  %v422_v40 = vmax.f32 %v402_v28, 0.0  ;;  %v481_v45 = vmax.f32 %v479_v20, %v480_v34 }
 0x155   :  { %v546_v18 = vsel %vm545_vm1, %v538_v7, %v537_v12 }
 0x156   :  { %v485_v37 = vrot.slane %v484_v31, 4  ;;  %v405_v41 = vadd.f32 %v772_v35, %v1036_v0  ;;  %v440_v51 = vmul.f32 %v1051_v33, %v422_v40  ;;  %v482_v56 = vrot.slane %v481_v45, 1 }
 0x157   :  { %v501_v33 = vpack.c.bf16 %v469_v60, %v469_v60  ;;  %v548_v20 = vsel %vm547_vm2, %v539_v10, %v546_v18 }
 0x158   :  { %v486_v43 = vmax.f32 %v484_v31, %v485_v37  ;;  %v423_v46 = vmax.f32 %v405_v41, 0.0  ;;  %v483_v1 = vmax.f32 %v481_v45, %v482_v56 }
 0x159   :  { %v540_v13 = vunpack.c.l.b16 %v501_v33 }
 0x15a   :  { %v487_v48 = vrot.slane %v486_v43, 2  ;;  %v441_v52 = vmul.f32 %v1048_v25, %v423_v46  ;;  %v502_v25 = vpack.c.bf16 %v476_v62, %v476_v62  ;;  %v503_v8 = vpack.c.bf16 %v483_v1, %v483_v1 }
 0x15b   :  { %v550_v22 = vsel %vm549_vm3, %v540_v13, %v548_v20 }
 0x15c   :  { %v488_v54 = vmax.f32 %v486_v43, %v487_v48  ;;  %v491_v57 = vmax.f32 %v440_v51, %v441_v52  ;;  %v541_v15 = vunpack.c.l.b16 %v502_v25  ;;  %v542_v17 = vunpack.c.l.b16 %v503_v8 }
 0x15e   :  { %v489_v0 = vrot.slane %v488_v54, 1  ;;  %v492_v61 = vrot.slane %v491_v57, 4  ;;  %v552_v23 = vsel %vm551_vm4, %v541_v15, %v550_v22 }
 0x15f   :  { %v554_v26 = vsel %vm553_vm5, %v542_v17, %v552_v23 }
 0x160   :  { %v493_v2 = vmax.f32 %v491_v57, %v492_v61  ;;  %v490_v4 = vmax.f32 %v488_v54, %v489_v0 }
 0x162   :  { %v494_v6 = vrot.slane %v493_v2, 2  ;;  %v504_v11 = vpack.c.bf16 %v490_v4, %v490_v4 }
 0x164   :  { %v495_v9 = vmax.f32 %v493_v2, %v494_v6  ;;  %v543_v19 = vunpack.c.l.b16 %v504_v11 }
 0x166   :  { %v496_v14 = vrot.slane %v495_v9, 1  ;;  %v556_v27 = vsel %vm555_vm6, %v543_v19, %v554_v26 }
 0x168   :  { %v497_v16 = vmax.f32 %v495_v9, %v496_v14 }
 0x16a   :  { %v505_v21 = vpack.c.bf16 %v497_v16, %v497_v16 }
 0x16c   :  { %v544_v24 = vunpack.c.l.b16 %v505_v21 }
 0x16e   :  { %v558_v28 = vsel %vm557_vm7, %v544_v24, %v556_v27 }
 0x16f   :  { %v559_v29 = vpack.c.b16 %v558_v28, %v558_v28 }
 0x171   :  { %799 = vmatmul.mubr.bf16.vlgmr.msra.gmra.mxu1 %v559_v29 }
 0x231   :  { %v643_v31 = vpop.f32.mrf.mxu1 }
 0x232   :  { %v644_v32 = vadd.f32 %v700_v30, %v643_v31 }
 0x233   :  { %v800_v34 = vpop.f32.mrf.mxu1 }
 0x234   :  { %649 = vst [vmem:[#allocation10] sm:$0xff] %v644_v32 }
 0x235   :  { %v646_v35 = vpop.f32.mrf.mxu1 }
 0x236   :  { %952 = shalt.err (!%p949_p10)
}
 0x237   :  { %659 = dma.vmem_to_hbm [thread:$0]  %s657_s21, 128, %s1086_s6, [#allocation4]   ;;  %v801_v36 = vpop.f32.mrf.mxu1 }
 0x238   :  { %967 = dma.done.wait [#allocation4], 128  }
 0x239   :  { %968 = vsyncadd [#allocation4], 4294967168 }
 0x23a   :  { %663 = vsyncpa [#allocation3], 1 }
 0x23b   :  { %664 = vsyncpa [#allocation6], 1 }
 0x23c   :  { %665 = vsyncpa [#allocation9], 1 }
 0x23d   :  { %666 = vsyncpa [#allocation4], 1 }

</bundles_post_ra>
